<compile_context>
chip_gen: v6e
topology: v6e:2x2x1
jax: 0.10.0
libtpu: 0.0.40
codegen_flags: <defaults>
</compile_context>

<pallas_src>
import jax
import jax.numpy as jnp
from jax.experimental import pallas as pl
from jax.experimental.pallas import tpu as pltpu

_LANE = 128  # last-dim (lane) granularity


def _round_up(n, m):
    return ((n + m - 1) // m) * m


def _pad_axis(a, target, axis):
    pad = target - a.shape[axis]
    if pad == 0:
        return a
    widths = [(0, 0)] * a.ndim
    widths[axis] = (0, pad)
    return jnp.pad(a, widths)


def _mlp_kernel(x_ref, w1_ref, b1_ref, w2_ref, b2_ref, o_ref):
    # In-kernel cast to the MXU compute dtype (VPU work, hidden under the MXU;
    # avoids a separate wrapper-side HBM pass over x).
    x = x_ref[...].astype(w1_ref.dtype)
    # Layer 1: bf16 x bf16 -> f32 accumulation on the MXU.
    h = jnp.dot(x, w1_ref[...], preferred_element_type=jnp.float32)
    # Bias-add + ReLU in f32 on the VPU.
    h = jnp.maximum(h + b1_ref[...], 0.0)
    # Layer 2: cast hidden activations to the weight dtype for the MXU,
    # f32 accumulation, f32 bias-add, store in the output dtype.
    y = jnp.dot(h.astype(w2_ref.dtype), w2_ref[...],
                preferred_element_type=jnp.float32)
    o_ref[...] = (y + b2_ref[...]).astype(o_ref.dtype)


def fc_forward(x, w1, b1, w2, b2, *, block_m=512, compute_dtype=jnp.bfloat16):
    """Forward pass of FC: relu(x @ w1 + b1) @ w2 + b2.

    x:  (B, inputSize)   float32
    w1: (inputSize, H0)  (transpose of PyTorch's (out, in) weight)
    b1: (H0,)
    w2: (H0, H1)
    b2: (H1,)
    Returns (B, H1) in x.dtype.
    """
    B, IN = x.shape
    H0 = w1.shape[1]
    H1 = w2.shape[1]
    out_dtype = x.dtype

    # Lane-dense padding only where it feeds the MXU contraction / hidden dims.
    # The output's last dim stays at the true H1 (a full-extent block is legal),
    # keeping HBM writeback narrow for small heads (e.g. H1=16).
    IN_p = _round_up(IN, _LANE)
    H0_p = _round_up(H0, _LANE)

    # Batch tile: multiple of 16 rows (bf16 packs 2 rows per sublane), as large
    # as block_m, but halved until the grid has >= 2 steps so v7x's two
    # TensorCores both get work on the "parallel" axis.
    row_align = 16 if jnp.dtype(compute_dtype).itemsize == 2 else 8
    bm = min(block_m, _round_up(B, row_align))
    bm = _round_up(bm, row_align)
    while bm > row_align and pl.cdiv(B, bm) < 2:
        bm = _round_up(max(bm // 2, row_align), row_align)
    B_p = _round_up(B, bm)

    # x is only touched in the wrapper when padding is genuinely required
    # (no dtype cast here -> no extra HBM pass in the aligned case).
    x_p = _pad_axis(_pad_axis(x, B_p, 0), IN_p, 1)
    w1_p = _pad_axis(_pad_axis(w1, IN_p, 0), H0_p, 1).astype(compute_dtype)
    w2_p = _pad_axis(w2, H0_p, 0).astype(compute_dtype)           # (H0_p, H1)
    b1_p = _pad_axis(b1.reshape(1, -1), H0_p, 1).astype(jnp.float32)
    b2_p = b2.reshape(1, -1).astype(jnp.float32)                  # (1, H1)

    grid = (B_p // bm,)

    w_itemsize = jnp.dtype(compute_dtype).itemsize
    x_itemsize = jnp.dtype(x.dtype).itemsize
    out_itemsize = jnp.dtype(out_dtype).itemsize

    # VMEM budget: double-buffered x/out tiles + single-buffered weights/biases.
    footprint = (2 * bm * IN_p * x_itemsize
                 + (IN_p * H0_p + H0_p * H1) * w_itemsize
                 + (H0_p + H1) * 4
                 + 2 * bm * H1 * out_itemsize)
    vmem_limit = min(max(int(footprint * 1.25) + (2 << 20), 32 << 20), 64 << 20)

    cost = pl.CostEstimate(
        flops=2 * B_p * (IN_p * H0_p + H0_p * H1),
        transcendentals=0,
        bytes_accessed=(B_p * IN_p * x_itemsize
                        + (IN_p * H0_p + H0_p * H1) * w_itemsize
                        + (H0_p + H1) * 4
                        + B_p * H1 * out_itemsize),
    )

    def _const(i):
        return (0, 0)

    # Invariant operands: DMA'd once, single VMEM buffer (no double-buffering).
    weight_mode = pl.Buffered(1)

    out_padded = pl.pallas_call(
        _mlp_kernel,
        out_shape=jax.ShapeDtypeStruct((B_p, H1), out_dtype),
        grid_spec=pltpu.PrefetchScalarGridSpec(
            num_scalar_prefetch=0,
            grid=grid,
            in_specs=[
                # x: one batch tile per grid step (software-pipelined).
                pl.BlockSpec((bm, IN_p), lambda i: (i, 0)),
                # Weights / biases: constant index_map, single-buffered.
                pl.BlockSpec((IN_p, H0_p), _const, pipeline_mode=weight_mode),
                pl.BlockSpec((1, H0_p), _const, pipeline_mode=weight_mode),
                pl.BlockSpec((H0_p, H1), _const, pipeline_mode=weight_mode),
                pl.BlockSpec((1, H1), _const, pipeline_mode=weight_mode),
            ],
            out_specs=pl.BlockSpec((bm, H1), lambda i: (i, 0)),
        ),
        compiler_params=pltpu.CompilerParams(
            # Batch tiles are independent -> shard across TensorCores (v7x).
            dimension_semantics=("parallel",),
            vmem_limit_bytes=vmem_limit,
        ),
        cost_estimate=cost,
    )(x_p, w1_p, b1_p, w2_p, b2_p)

    return out_padded[:B] if B_p != B else out_padded


def init_fc_params(key, input_size, hidden_sizes, dtype=jnp.float32):
    """Deterministic init matching nn.Linear's default U(-1/sqrt(fan_in), +1/sqrt(fan_in))."""
    h0, h1 = hidden_sizes
    k1, k2, k3, k4 = jax.random.split(key, 4)
    bound1 = 1.0 / jnp.sqrt(input_size)
    bound2 = 1.0 / jnp.sqrt(h0)
    # Stored as (in, out) == transpose of PyTorch's (out, in) weight.
    w1 = jax.random.uniform(k1, (input_size, h0), dtype, -bound1, bound1)
    b1 = jax.random.uniform(k2, (h0,), dtype, -bound1, bound1)
    w2 = jax.random.uniform(k3, (h0, h1), dtype, -bound2, bound2)
    b2 = jax.random.uniform(k4, (h1,), dtype, -bound2, bound2)
    return w1, b1, w2, b2


if __name__ == "__main__":
    key = jax.random.PRNGKey(0)
    kx, kp = jax.random.split(key)

    # Small-but-grid-exercising shapes: bm collapses 256 -> 128 to give a
    # 2-step parallel grid (both v7x TensorCores busy).
    batch = 256
    input_size = 32
    hidden_sizes = (64, 16)

    x = jax.random.normal(kx, (batch, input_size), dtype=jnp.float32)
    w1, b1, w2, b2 = init_fc_params(kp, input_size, hidden_sizes)

    out = fc_forward(x, w1, b1, w2, b2)
    out = jax.block_until_ready(out)
    assert out.shape == (batch, hidden_sizes[1])
    assert out.dtype == x.dtype

    # Reference 1: same bf16-input / f32-accumulate recipe in plain JAX (tight).
    xb, w1b, w2b = (a.astype(jnp.bfloat16) for a in (x, w1, w2))
    h_ref = jnp.maximum(
        jnp.dot(xb, w1b, preferred_element_type=jnp.float32) + b1, 0.0)
    ref_bf16 = jnp.dot(h_ref.astype(jnp.bfloat16), w2b,
                       preferred_element_type=jnp.float32) + b2
    assert jnp.allclose(out, ref_bf16, atol=2e-4, rtol=2e-4)

    # Reference 2: full-f32 math (documented bf16 rounding -> loose tolerance).
    ref_f32 = jnp.maximum(x @ w1 + b1, 0.0) @ w2 + b2
    assert jnp.allclose(out, ref_f32, atol=5e-2, rtol=5e-2)

    print("KERNEL_OK")
</pallas_src>

<mosaic_0001>
module attributes {stable_mosaic.version = 11 : i64} {
  func.func @_mlp_kernel(%arg0: i32, %arg1: memref<128x128xf32, #tpu.memory_space<vmem>>, %arg2: memref<128x128xbf16, #tpu.memory_space<vmem>>, %arg3: memref<1x128xf32, #tpu.memory_space<vmem>>, %arg4: memref<128x16xbf16, #tpu.memory_space<vmem>>, %arg5: memref<1x16xf32, #tpu.memory_space<vmem>>, %arg6: memref<128x16xf32, #tpu.memory_space<vmem>>) attributes {dimension_semantics = [#tpu.dimension_semantics<parallel>], iteration_bounds = array<i64: 2>, scalar_prefetch = 0 : i64, scratch_operands = 0 : i64, tpu.core_type = #tpu.core_type<tc>, window_params = [{transform_indices = @transform_0, window_bounds = array<i64: 128, 128>}, {pipeline_mode = #tpu.pipeline_mode<synchronous>, transform_indices = @transform_1, window_bounds = array<i64: 128, 128>}, {pipeline_mode = #tpu.pipeline_mode<synchronous>, transform_indices = @transform_2, window_bounds = array<i64: 1, 128>}, {pipeline_mode = #tpu.pipeline_mode<synchronous>, transform_indices = @transform_3, window_bounds = array<i64: 128, 16>}, {pipeline_mode = #tpu.pipeline_mode<synchronous>, transform_indices = @transform_4, window_bounds = array<i64: 1, 16>}, {transform_indices = @transform_5, window_bounds = array<i64: 128, 16>}]} {
    %c0 = arith.constant 0 : index
    %c0_0 = arith.constant 0 : index
    %0 = vector.load %arg1[%c0, %c0_0] : memref<128x128xf32, #tpu.memory_space<vmem>>, vector<128x128xf32>
    %1 = arith.truncf %0 : vector<128x128xf32> to vector<128x128xbf16>
    %c0_1 = arith.constant 0 : index
    %c0_2 = arith.constant 0 : index
    %2 = vector.load %arg2[%c0_1, %c0_2] : memref<128x128xbf16, #tpu.memory_space<vmem>>, vector<128x128xbf16>
    %cst = arith.constant dense<0.000000e+00> : vector<128x128xf32>
    %3 = tpu.matmul %1, %2, %cst {dimension_numbers = #tpu.dot_dimension_numbers<[1], [0], [0], [1], [0, 0, 1, 1], [], []>} : vector<128x128xbf16>, vector<128x128xbf16>, vector<128x128xf32> -> vector<128x128xf32>
    %c0_3 = arith.constant 0 : index
    %c0_4 = arith.constant 0 : index
    %4 = vector.load %arg3[%c0_3, %c0_4] : memref<1x128xf32, #tpu.memory_space<vmem>>, vector<1x128xf32>
    %5 = vector.broadcast %4 : vector<1x128xf32> to vector<128x128xf32>
    %6 = arith.addf %3, %5 : vector<128x128xf32>
    %cst_5 = arith.constant 0.000000e+00 : f32
    %7 = vector.broadcast %cst_5 : f32 to vector<128x128xf32>
    %8 = arith.maximumf %6, %7 : vector<128x128xf32>
    %9 = arith.truncf %8 : vector<128x128xf32> to vector<128x128xbf16>
    %c0_6 = arith.constant 0 : index
    %c0_7 = arith.constant 0 : index
    %10 = vector.load %arg4[%c0_6, %c0_7] : memref<128x16xbf16, #tpu.memory_space<vmem>>, vector<128x16xbf16>
    %cst_8 = arith.constant dense<0.000000e+00> : vector<128x16xf32>
    %11 = tpu.matmul %9, %10, %cst_8 {dimension_numbers = #tpu.dot_dimension_numbers<[1], [0], [0], [1], [0, 0, 1, 1], [], []>} : vector<128x128xbf16>, vector<128x16xbf16>, vector<128x16xf32> -> vector<128x16xf32>
    %c0_9 = arith.constant 0 : index
    %c0_10 = arith.constant 0 : index
    %12 = vector.load %arg5[%c0_9, %c0_10] : memref<1x16xf32, #tpu.memory_space<vmem>>, vector<1x16xf32>
    %13 = vector.broadcast %12 : vector<1x16xf32> to vector<128x16xf32>
    %14 = arith.addf %11, %13 : vector<128x16xf32>
    %c0_11 = arith.constant 0 : index
    %c0_12 = arith.constant 0 : index
    %15 = vector.load %arg6[%c0_11, %c0_12] : memref<128x16xf32, #tpu.memory_space<vmem>>, vector<128x16xf32>
    tpu.vector_store %arg6[%c0_11, %c0_12], %14 {strides = array<i32>} : memref<128x16xf32, #tpu.memory_space<vmem>>, vector<128x16xf32>,
    return
  }
  func.func @transform_0(%arg0: i32) -> (i32, i32) {
    %c0_i32 = arith.constant 0 : i32
    %c0_i32_0 = arith.constant 0 : i32
    return %arg0, %c0_i32 : i32, i32
  }
  func.func @transform_1(%arg0: i32) -> (i32, i32) {
    %c0_i32 = arith.constant 0 : i32
    %c0_i32_0 = arith.constant 0 : i32
    %c0_i32_1 = arith.constant 0 : i32
    return %c0_i32, %c0_i32_0 : i32, i32
  }
  func.func @transform_2(%arg0: i32) -> (i32, i32) {
    %c0_i32 = arith.constant 0 : i32
    %c0_i32_0 = arith.constant 0 : i32
    %c0_i32_1 = arith.constant 0 : i32
    return %c0_i32, %c0_i32_0 : i32, i32
  }
  func.func @transform_3(%arg0: i32) -> (i32, i32) {
    %c0_i32 = arith.constant 0 : i32
    %c0_i32_0 = arith.constant 0 : i32
    %c0_i32_1 = arith.constant 0 : i32
    return %c0_i32, %c0_i32_0 : i32, i32
  }
  func.func @transform_4(%arg0: i32) -> (i32, i32) {
    %c0_i32 = arith.constant 0 : i32
    %c0_i32_0 = arith.constant 0 : i32
    %c0_i32_1 = arith.constant 0 : i32
    return %c0_i32, %c0_i32_0 : i32, i32
  }
  func.func @transform_5(%arg0: i32) -> (i32, i32) {
    %c0_i32 = arith.constant 0 : i32
    %c0_i32_0 = arith.constant 0 : i32
    return %arg0, %c0_i32 : i32, i32
  }
}

</mosaic_0001>

<bundles_post_ra>
// kernel: tpu_custom_call.1
= control target key start
LH: loop header
LB: loop body
LE: loop exit
PB: predicated region body
PF: predicated region fallthrough
CT: control target
= control target key end

     0   :  { %10 = vsyncpa [#allocation3], 0  ;;  %s1204_s0 = inlined_call_operand.hbm [shape: f32[256,128], index: 0, kind: input, shape index: {}]   ;;  %s1205_s1 = inlined_call_operand.vmem [shape: bf16[128,128], index: 1, kind: input, shape index: {}]   ;;  %s1206_s2 = inlined_call_operand.vmem [shape: f32[1,128], index: 2, kind: input, shape index: {}]   ;;  %s1207_s3 = inlined_call_operand.vmem [shape: bf16[128,16], index: 3, kind: input, shape index: {}]   ;;  %s1208_s4 = inlined_call_operand.vmem [shape: f32[1,16], index: 4, kind: input, shape index: {}]   ;;  %s1209_s5 = inlined_call_operand.vmem [shape: f32[256,16], index: 5, kind: output, shape index: {}]  }
   0x1   :  { %12 = vsyncpa [#allocation3 + $0x1], 0  ;;  %s998_s18 = smov 0   ;;  %s1000_s19 = smov 0  }
   0x2   :  { %s1002_s20 = smov 0   ;;  %s1004_s21 = smov 0  }
   0x3 LB: > { %s716_s22 = sadd.s32 4294967295, %s963_s21   ;;  %s1018_s23 = sadd.s32 1, %s963_s21   ;;  %s963_s21 = sphi %s1004_s21, %s1218_s21   ;;  %s959_s20 = sphi %s1002_s20, %s1217_s20   ;;  %s955_s19 = sphi %s1000_s19, %s1216_s19   ;;  %s951_s18 = sphi %s998_s18, %s1215_s18  }
   0x4   : > { %s22_s24 = ssub.s32 %s963_s21, %s1018_s23  ;;  %s25_s25 = sadd.s32 1, %s959_s20 }
   0x5   : > { %p23_p0 = scmp.eq.s32.totalorder %s22_s24, 0  ;;  %p32_p1 = scmp.ne.s32.totalorder %s959_s20, %s955_s19 }
   0x6   : > { %p33_p2 = scmp.eq.s32.totalorder %s963_s21, 0  ;;  %p38_p3 = scmp.ne.s32.totalorder %s955_s19, %s951_s18 }
   0x7   : > { %s1028_s26 = scalar_select %p23_p0, %s959_s20, %s25_s25  }
   0x8   : > { %p34_p4 = por %p33_p2, %p32_p1  ;;  %p39_p5 = scmp.eq.s32.totalorder %s716_s22, 0 }
   0x9   : > { %p850_p6 = scmp.lt.s32.totalorder %s963_s21, 2  ;;  %s184_s28 = sand.u32 1, %s959_s20  }
   0xa   : > { %p1033_p7 = por %p39_p5, %p38_p3  ;;  %s720_s29 = sshll.u32 %s184_s28, 7 }
   0xb   : > { %s747_s30 = sshll.u32 %s963_s21, 11  ;;  %s188_s9 = scalar_lea.vmem [#allocation2], %s720_s29 }
   0xc   : > { %s1211_s27 = scalar_select %p1033_p7, 1, 0 }
   0xd   : > { %s1042_s8 = scalar_lea.hbm %s1204_s0, %s747_s30  ;;  %s195_s10 = sshll.u32 %s188_s9, 4  ;;  %s1044_s10 = int_to_ptr.vmem [resolvable:$true] %s195_s10 }
   0xe   : > { %p1046_p8 = pnand %p850_p6, %p34_p4  ;;  %s1051_s12 = scalar_lea.sflag [#allocation3], %s184_s28 }
   0xf   : > { %s901_s13 = scalar_lea.hbm %s1042_s8, 2048  ;;  %s906_s16 = scalar_lea.hbm %s1204_s0, 4096 }
  0x10   : > { %p902_p10 = scmp.ne.s32.totalorder %s1042_s8, %s901_s13  ;;  %p903_p11 = pneg %p1046_p8 }
  0x11   : > { %p907_p0 = scmp.lt.s32.totalorder %s1042_s8, %s1204_s0  ;;  %p908_p1 = scmp.lt.s32.totalorder %s906_s16, %s901_s13 }
  0x12   : > { %p904_p12 = pnand %p903_p11, %p902_p10 }
  0x13   : > { %p909_p2 = por %p908_p1, %p907_p0 }
  0x14   : > { %p905_p13 = pneg %p904_p12 }
  0x16   : > { %p910_p3 = pnand %p909_p2, %p905_p13 }
  0x18   : > { %913 = shalt.err (!%p910_p3)
}
  0x19   : > { %s914_s24 = scalar_lea.vmem %s1044_s10, 2048  ;;  %s965_s25 = smov [#allocation2]  }
  0x1a   : > { %p915_p4 = scmp.ne.s32.totalorder %s1044_s10, %s914_s24  ;;  %s919_s28 = sshll.u32 %s965_s25, 4  ;;  %s920_s28 = int_to_ptr.vmem [resolvable:$false] %s919_s28 }
  0x1b   : > { %s921_s29 = scalar_lea.vmem %s920_s28, 4096  ;;  %p922_p10 = scmp.lt.s32.totalorder %s1044_s10, %s920_s28 }
  0x1c   : > { %p917_p5 = pnand %p915_p4, %p903_p11  ;;  %p923_p12 = scmp.lt.s32.totalorder %s921_s29, %s914_s24 }
  0x1e   : > { %p918_p6 = pneg %p917_p5  ;;  %p924_p9 = por %p923_p12, %p922_p10 }
  0x20   : > { %p925_p7 = pnand %p924_p9, %p918_p6 }
  0x22   : > { %928 = shalt.err (!%p925_p7)
}
  0x23   : > { %s966_s30 = smov 128   ;;  %s967_s6 = smov 8  }
  0x24   : > { %849 = dma.hbm_to_vmem [thread:$0]  (!%p1046_p8), %s1042_s8, 2048, %s1044_s10, %s1051_s12, %s966_s30, %s966_s30, %s967_s6  }
  0x25   : > { %p203_p11 = scmp.lt.s32.totalorder %s963_s21, 3  ;;  %p1213_p13 = scmp.ge.s32.totalorder %s963_s21, 1 }
  0x27   : > { %p204_p0 = pnand %p1213_p13, %p203_p11 }
  0x28   : > { %s209_s7 = sand.u32 (!%p204_p0), 1, %s955_s19   ;;  %p1214_p7 = scmp.ne.s32.totalorder (!%p204_p0), %s1211_s27, 0 }
  0x29   : > { %207 = sbr.rel (%p204_p0) target bundleno = 512 (0x200), region = 40  ;;  %s724_s9 = sshll.u32 (!%p204_p0), %s209_s7, 7 }
  0x2a   : > { %s210_s13 = scalar_lea.sflag (!%p204_p0), [#allocation3], %s209_s7  ;;  %s1076_s14 = scalar_lea.vmem (!%p204_p0), [#allocation2], %s724_s9 }
  0x2e   : > { %946 = dma.done.wait (%p1214_p7), %s210_s13, 2048  }
  0x2f   : > { %948 = vsyncadd (%p1214_p7), %s210_s13, 4294965248  ;;  %v885_v0 = vld [vmem:[%s1205_s1 + $0x38] sm:$0xff]   ;;  %v886_v1 = vld [vmem:[%s1205_s1 + $0x30] sm:$0xff]   ;;  %s725_s7 = sshll.u32 %s716_s22, 4  ;;  %vm632_vm0 = vcmask 130048  }
  0x30   : > { %780 = vmatprep.subr.bf16.mxu0 %v885_v0  ;;  %v887_v2 = vld [vmem:[%s1205_s1 + $0x28] sm:$0xff]   ;;  %v888_v3 = vld [vmem:[%s1205_s1 + $0x20] sm:$0xff]   ;;  %v889_v7 = vld [vmem:[%s1205_s1 + $0x18] sm:$0xff]   ;;  %p242_p8 = scmp.lt.s32.totalorder %s725_s7, 31 }
  0x31   : > { %781 = vmatpush3.bf16.msra.mxu0 %v885_v0  ;;  %v248_v4 = vld [vmem:[%s1076_s14] sm:$0xff]  ;;  %v249_v5 = vld [vmem:[%s1076_s14 + $0x8] sm:$0xff]  ;;  %v893_v8 = vld [vmem:[%s1207_s3 + $0x38] sm:$0xff]  }
  0x32   : > { %782 = vmatprep.subr.bf16.mxu0 %v886_v1  ;;  %v264_v6 = vpack.c.bf16 %v249_v5, %v248_v4  ;;  %v894_v9 = vld [vmem:[%s1207_s3 + $0x30] sm:$0xff]   ;;  %812 = vmatprep.subr.bf16.mxu1 %v893_v8  ;;  %v895_v11 = vld [vmem:[%s1207_s3 + $0x28] sm:$0xff]   ;;  %v896_v13 = vld [vmem:[%s1207_s3 + $0x20] sm:$0xff]   ;;  %s1220_s7 = smov (!%p242_p8, %s725_s7), 31 }
  0x33   : > { %v890_v10 = vld [vmem:[%s1205_s1 + $0x10] sm:$0xff]   ;;  %813 = vmatpush3.bf16.msra.mxu1 %v893_v8  ;;  %v891_v12 = vld [vmem:[%s1205_s1 + $0x8] sm:$0xff]   ;;  %v892_v14 = vld [vmem:[%s1205_s1] sm:$0xff]   ;;  %s726_s9 = sshll.u32 %s1220_s7, 3 }
  0x34   : > { %796 = vmatprep.mubr.bf16.mxu0 %v264_v6  ;;  %814 = vmatprep.subr.bf16.mxu1 %v894_v9  ;;  %v897_v15 = vld [vmem:[%s1207_s3 + $0x18] sm:$0xff]   ;;  %v250_v16 = vld [vmem:[%s1076_s14 + $0x10] sm:$0xff]  ;;  %v252_v18 = vld [vmem:[%s1076_s14 + $0x20] sm:$0xff]  ;;  %s1157_s10 = scalar_lea.vmem %s1209_s5, %s726_s9 }
  0x35   : > { %783 = vmatpush3.bf16.msra.mxu0 %v886_v1  ;;  %v251_v17 = vld [vmem:[%s1076_s14 + $0x18] sm:$0xff]  ;;  %v253_v19 = vld [vmem:[%s1076_s14 + $0x28] sm:$0xff]  ;;  %v254_v22 = vld [vmem:[%s1076_s14 + $0x30] sm:$0xff] }
  0x36   : > { %784 = vmatprep.subr.bf16.mxu0 %v887_v2  ;;  %v265_v20 = vpack.c.bf16 %v251_v17, %v250_v16  ;;  %v266_v21 = vpack.c.bf16 %v253_v19, %v252_v18  ;;  %v255_v23 = vld [vmem:[%s1076_s14 + $0x38] sm:$0xff]  ;;  %v256_v24 = vld [vmem:[%s1076_s14 + $0x40] sm:$0xff]  ;;  %v257_v25 = vld [vmem:[%s1076_s14 + $0x48] sm:$0xff] }
  0x37   : > { %815 = vmatpush3.bf16.msra.mxu1 %v894_v9  ;;  %v267_v26 = vpack.c.bf16 %v255_v23, %v254_v22  ;;  %v268_v27 = vpack.c.bf16 %v257_v25, %v256_v24  ;;  %v258_v28 = vld [vmem:[%s1076_s14 + $0x50] sm:$0xff]  ;;  %v259_v29 = vld [vmem:[%s1076_s14 + $0x58] sm:$0xff]  ;;  %v260_v30 = vld [vmem:[%s1076_s14 + $0x60] sm:$0xff] }
  0x38   : > { %816 = vmatprep.subr.bf16.mxu1 %v895_v11  ;;  %v261_v31 = vld [vmem:[%s1076_s14 + $0x68] sm:$0xff]  ;;  %v269_v32 = vpack.c.bf16 %v259_v29, %v258_v28  ;;  %v262_v34 = vld [vmem:[%s1076_s14 + $0x70] sm:$0xff]  ;;  %v263_v35 = vld [vmem:[%s1076_s14 + $0x78] sm:$0xff] }
  0x39   : > { %785 = vmatpush3.bf16.msra.mxu0 %v887_v2  ;;  %v270_v33 = vpack.c.bf16 %v261_v31, %v260_v30  ;;  %v271_v36 = vpack.c.bf16 %v263_v35, %v262_v34  ;;  %v898_v37 = vld [vmem:[%s1207_s3 + $0x10] sm:$0xff]   ;;  %v899_v38 = vld [vmem:[%s1207_s3 + $0x8] sm:$0xff]   ;;  %v900_v39 = vld [vmem:[%s1207_s3] sm:$0xff]  }
  0x3a   : > { %786 = vmatprep.subr.bf16.mxu0 %v888_v3  ;;  %v727_v42 = vld [vmem:[%s1206_s2] ss:$0 sm:$0xff] }
  0x3b   : > { %817 = vmatpush3.bf16.msra.mxu1 %v895_v11 }
  0x3c   : > { %818 = vmatprep.subr.bf16.mxu1 %v896_v13 }
  0x3d   : > { %787 = vmatpush3.bf16.msra.mxu0 %v888_v3 }
  0x3e   : > { %788 = vmatprep.subr.bf16.mxu0 %v889_v7 }
  0x3f   : > { %819 = vmatpush3.bf16.msra.mxu1 %v896_v13 }
  0x40   : > { %820 = vmatprep.subr.bf16.mxu1 %v897_v15 }
  0x41   : > { %789 = vmatpush3.bf16.msra.mxu0 %v889_v7 }
  0x42   : > { %790 = vmatprep.subr.bf16.mxu0 %v890_v10 }
  0x43   : > { %821 = vmatpush3.bf16.msra.mxu1 %v897_v15 }
  0x44   : > { %822 = vmatprep.subr.bf16.mxu1 %v898_v37 }
  0x45   : > { %791 = vmatpush3.bf16.msra.mxu0 %v890_v10 }
  0x46   : > { %792 = vmatprep.subr.bf16.mxu0 %v891_v12 }
  0x47   : > { %823 = vmatpush3.bf16.msra.mxu1 %v898_v37 }
  0x48   : > { %824 = vmatprep.subr.bf16.mxu1 %v899_v38 }
  0x49   : > { %793 = vmatpush3.bf16.msra.mxu0 %v891_v12 }
  0x4a   : > { %794 = vmatprep.subr.bf16.mxu0 %v892_v14 }
  0x4b   : > { %825 = vmatpush3.bf16.msra.mxu1 %v899_v38 }
  0x4c   : > { %826 = vmatprep.subr.bf16.mxu1 %v900_v39 }
  0x4d   : > { %795 = vmatpush3.bf16.msra.mxu0 %v892_v14 }
  0x4f   : > { %827 = vmatpush3.bf16.msra.mxu1 %v900_v39 }
  0x50   : > { %797 = vmatmul.mubr.bf16.vlgmr.msra.gmra.mxu0 %v265_v20 }
  0x51   : > { %800 = vmatprep.mubr.bf16.mxu0 %v266_v21 }
  0x58   : > { %801 = vmatmul.mubr.bf16.gmra.mxu0 %v267_v26 }
  0x59   : > { %804 = vmatprep.mubr.bf16.mxu0 %v268_v27 }
  0x60   : > { %805 = vmatmul.mubr.bf16.gmra.mxu0 %v269_v32 }
  0x61   : > { %808 = vmatprep.mubr.bf16.mxu0 %v270_v33  ;;  %v736_v33 = vld [vmem:[%s1208_s4] ss:$0 sm:$0xff] }
  0x68   : > { %809 = vmatmul.mubr.bf16.gmra.mxu0 %v271_v36 }
 0x110   : > { %v798_v40 = vpop.f32.mrf.mxu0 }
 0x111   : > { %v386_v46 = vadd.f32 %v798_v40, %v727_v42 }
 0x112   : > { %v377_v41 = vpop.f32.mrf.mxu0 }
 0x113   : > { %v378_v44 = vadd.f32 %v727_v42, %v377_v41  ;;  %v442_v53 = vmax.f32 %v386_v46, 0.0 }
 0x114   : > { %v799_v43 = vpop.f32.mrf.mxu0 }
 0x115   : > { %v389_v45 = vadd.f32 %v799_v43, %v727_v42  ;;  %v440_v51 = vmax.f32 %v378_v44, 0.0 }
 0x116   : > { %v380_v47 = vpop.f32.mrf.mxu0 }
 0x117   : > { %v381_v48 = vadd.f32 %v727_v42, %v380_v47  ;;  %v443_v49 = vmax.f32 %v389_v45, 0.0 }
 0x118   : > { %v802_v50 = vpop.f32.mrf.mxu0 }
 0x119   : > { %v441_v52 = vmax.f32 %v381_v48, 0.0  ;;  %v457_v56 = vpack.c.bf16 %v443_v49, %v442_v53  ;;  %v402_v60 = vadd.f32 %v802_v50, %v727_v42 }
 0x11a   : > { %v393_v54 = vpop.f32.mrf.mxu0 }
 0x11b   : > { %v456_v55 = vpack.c.bf16 %v441_v52, %v440_v51  ;;  %v394_v58 = vadd.f32 %v727_v42, %v393_v54  ;;  %v446_v3 = vmax.f32 %v402_v60, 0.0 }
 0x11c   : > { %v803_v57 = vpop.f32.mrf.mxu0 }
 0x11d   : > { %v405_v59 = vadd.f32 %v803_v57, %v727_v42  ;;  %828 = vmatprep.mubr.bf16.mxu1 %v456_v55  ;;  %v444_v1 = vmax.f32 %v394_v58, 0.0 }
 0x11e   : > { %v396_v61 = vpop.f32.mrf.mxu0  ;;  %829 = vmatmul.mubr.bf16.vlgmr.msra.gmra.mxu1 %v457_v56 }
 0x11f   : > { %v397_v62 = vadd.f32 %v727_v42, %v396_v61  ;;  %v447_v63 = vmax.f32 %v405_v59, 0.0 }
 0x120   : > { %v806_v0 = vpop.f32.mrf.mxu0 }
 0x121   : > { %v445_v2 = vmax.f32 %v397_v62, 0.0  ;;  %v459_v6 = vpack.c.bf16 %v447_v63, %v446_v3  ;;  %v418_v10 = vadd.f32 %v806_v0, %v727_v42 }
 0x122   : > { %v409_v4 = vpop.f32.mrf.mxu0 }
 0x123   : > { %v458_v5 = vpack.c.bf16 %v445_v2, %v444_v1  ;;  %v410_v8 = vadd.f32 %v727_v42, %v409_v4  ;;  %v450_v17 = vmax.f32 %v418_v10, 0.0 }
 0x124   : > { %v807_v7 = vpop.f32.mrf.mxu0 }
 0x125   : > { %v421_v9 = vadd.f32 %v807_v7, %v727_v42  ;;  %832 = vmatprep.mubr.bf16.mxu1 %v458_v5  ;;  %v448_v15 = vmax.f32 %v410_v8, 0.0 }
 0x126   : > { %v412_v11 = vpop.f32.mrf.mxu0  ;;  %833 = vmatmul.mubr.bf16.gmra.mxu1 %v459_v6 }
 0x127   : > { %v413_v12 = vadd.f32 %v727_v42, %v412_v11  ;;  %v451_v13 = vmax.f32 %v421_v9, 0.0 }
 0x128   : > { %v810_v14 = vpop.f32.mrf.mxu0 }
 0x129   : > { %v449_v16 = vmax.f32 %v413_v12, 0.0  ;;  %v461_v20 = vpack.c.bf16 %v451_v13, %v450_v17  ;;  %v434_v24 = vadd.f32 %v810_v14, %v727_v42 }
 0x12a   : > { %v425_v18 = vpop.f32.mrf.mxu0 }
 0x12b   : > { %v460_v19 = vpack.c.bf16 %v449_v16, %v448_v15  ;;  %v426_v22 = vadd.f32 %v727_v42, %v425_v18  ;;  %v454_v30 = vmax.f32 %v434_v24, 0.0 }
 0x12c   : > { %v811_v21 = vpop.f32.mrf.mxu0 }
 0x12d   : > { %v437_v23 = vadd.f32 %v811_v21, %v727_v42  ;;  %836 = vmatprep.mubr.bf16.mxu1 %v460_v19  ;;  %v452_v28 = vmax.f32 %v426_v22, 0.0 }
 0x12e   : > { %v428_v25 = vpop.f32.mrf.mxu0  ;;  %837 = vmatmul.mubr.bf16.gmra.mxu1 %v461_v20 }
 0x12f   : > { %v429_v26 = vadd.f32 %v727_v42, %v428_v25  ;;  %v455_v27 = vmax.f32 %v437_v23, 0.0 }
 0x131   : > { %v453_v29 = vmax.f32 %v429_v26, 0.0  ;;  %v463_v32 = vpack.c.bf16 %v455_v27, %v454_v30 }
 0x133   : > { %v462_v31 = vpack.c.bf16 %v453_v29, %v452_v28 }
 0x135   : > { %840 = vmatprep.mubr.bf16.mxu1 %v462_v31 }
 0x136   : > { %841 = vmatmul.mubr.bf16.gmra.mxu1 %v463_v32 }
 0x1de   : > { %v830_v34 = vpop.f32.mrf.mxu1 }
 0x1df   : > { %v578_v35 = vadd.f32 %v830_v34, %v736_v33 }
 0x1e0   : > { %v569_v36 = vpop.f32.mrf.mxu1 }
 0x1e1   : > { %635 = vst.msk [vmem:[%s1157_s10 + $0x10] sm:$0xff] %vm632_vm0, %v578_v35  ;;  %v570_v37 = vadd.f32 %v736_v33, %v569_v36 }
 0x1e2   : > { %v831_v38 = vpop.f32.mrf.mxu1 }
 0x1e3   : > { %633 = vst.msk [vmem:[%s1157_s10] sm:$0xff] %vm632_vm0, %v570_v37  ;;  %v581_v39 = vadd.f32 %v831_v38, %v736_v33 }
 0x1e4   : > { %v572_v40 = vpop.f32.mrf.mxu1 }
 0x1e5   : > { %636 = vst.msk [vmem:[%s1157_s10 + $0x18] sm:$0xff] %vm632_vm0, %v581_v39  ;;  %v573_v41 = vadd.f32 %v736_v33, %v572_v40 }
 0x1e6   : > { %v834_v42 = vpop.f32.mrf.mxu1 }
 0x1e7   : > { %634 = vst.msk [vmem:[%s1157_s10 + $0x8] sm:$0xff] %vm632_vm0, %v573_v41  ;;  %v594_v43 = vadd.f32 %v834_v42, %v736_v33 }
 0x1e8   : > { %v585_v44 = vpop.f32.mrf.mxu1 }
 0x1e9   : > { %639 = vst.msk [vmem:[%s1157_s10 + $0x30] sm:$0xff] %vm632_vm0, %v594_v43  ;;  %v586_v45 = vadd.f32 %v736_v33, %v585_v44 }
 0x1ea   : > { %v835_v46 = vpop.f32.mrf.mxu1 }
 0x1eb   : > { %637 = vst.msk [vmem:[%s1157_s10 + $0x20] sm:$0xff] %vm632_vm0, %v586_v45  ;;  %v597_v47 = vadd.f32 %v835_v46, %v736_v33 }
 0x1ec   : > { %v588_v48 = vpop.f32.mrf.mxu1 }
 0x1ed   : > { %640 = vst.msk [vmem:[%s1157_s10 + $0x38] sm:$0xff] %vm632_vm0, %v597_v47  ;;  %v589_v49 = vadd.f32 %v736_v33, %v588_v48 }
 0x1ee   : > { %v838_v50 = vpop.f32.mrf.mxu1 }
 0x1ef   : > { %638 = vst.msk [vmem:[%s1157_s10 + $0x28] sm:$0xff] %vm632_vm0, %v589_v49  ;;  %v610_v51 = vadd.f32 %v838_v50, %v736_v33 }
 0x1f0   : > { %v601_v52 = vpop.f32.mrf.mxu1 }
 0x1f1   : > { %643 = vst.msk [vmem:[%s1157_s10 + $0x50] sm:$0xff] %vm632_vm0, %v610_v51  ;;  %v602_v53 = vadd.f32 %v736_v33, %v601_v52 }
 0x1f2   : > { %v839_v54 = vpop.f32.mrf.mxu1 }
 0x1f3   : > { %641 = vst.msk [vmem:[%s1157_s10 + $0x40] sm:$0xff] %vm632_vm0, %v602_v53  ;;  %v613_v55 = vadd.f32 %v839_v54, %v736_v33 }
 0x1f4   : > { %v604_v56 = vpop.f32.mrf.mxu1 }
 0x1f5   : > { %644 = vst.msk [vmem:[%s1157_s10 + $0x58] sm:$0xff] %vm632_vm0, %v613_v55  ;;  %v605_v57 = vadd.f32 %v736_v33, %v604_v56 }
 0x1f6   : > { %v842_v58 = vpop.f32.mrf.mxu1 }
 0x1f7   : > { %642 = vst.msk [vmem:[%s1157_s10 + $0x48] sm:$0xff] %vm632_vm0, %v605_v57  ;;  %v626_v59 = vadd.f32 %v842_v58, %v736_v33 }
 0x1f8   : > { %v617_v60 = vpop.f32.mrf.mxu1 }
 0x1f9   : > { %647 = vst.msk [vmem:[%s1157_s10 + $0x70] sm:$0xff] %vm632_vm0, %v626_v59  ;;  %v618_v61 = vadd.f32 %v736_v33, %v617_v60 }
 0x1fa   : > { %v843_v62 = vpop.f32.mrf.mxu1 }
 0x1fb   : > { %645 = vst.msk [vmem:[%s1157_s10 + $0x60] sm:$0xff] %vm632_vm0, %v618_v61  ;;  %v629_v63 = vadd.f32 %v843_v62, %v736_v33 }
 0x1fc   : > { %v620_v0 = vpop.f32.mrf.mxu1 }
 0x1fd   : > { %648 = vst.msk [vmem:[%s1157_s10 + $0x78] sm:$0xff] %vm632_vm0, %v629_v63  ;;  %v621_v1 = vadd.f32 %v736_v33, %v620_v0 }
 0x1ff   : > { %646 = vst.msk [vmem:[%s1157_s10 + $0x68] sm:$0xff] %vm632_vm0, %v621_v1 }
 0x200 PF: > { %p15_p9 = scmp.ge.s32.totalorder %s1018_s23, 4   ;;  %s1215_s18 = smov %s955_s19 }
 0x201   : > { %s1216_s19 = smov %s959_s20  ;;  %s1217_s20 = smov %s1028_s26 }
 0x202   : > { %s1218_s21 = smov %s1018_s23  ;;  %17 = sbr.rel (!%p15_p9) target bundleno = 3 (0x3), region = 80 }
 0x207   :  { %671 = vsyncpa [#allocation3], 1 }
 0x208   :  { %673 = vsyncpa [#allocation3 + $0x1], 1 }

</bundles_post_ra>
